<compile_context>
chip_gen: v6e
topology: v6e:2x2x1
jax: 0.10.0
libtpu: 0.0.40
codegen_flags: <defaults>
</compile_context>

<pallas_src>
import jax
import jax.numpy as jnp
from jax.experimental import pallas as pl
from jax.experimental.pallas import tpu as pltpu

_SQRT_2_OVER_PI = 0.7978845608028654  # sqrt(2/pi)
_GELU_C = 0.044715


def _round_up(x, m):
    return ((x + m - 1) // m) * m


def _cdiv(a, b):
    return -(-a // b)


def _gelu_and_grad(z):
    """tanh-approx GELU and its elementwise derivative (f32, VPU poly + EUP tanh)."""
    z2 = z * z
    u = _SQRT_2_OVER_PI * (z + _GELU_C * z2 * z)
    t = jnp.tanh(u)
    gelu = 0.5 * z * (1.0 + t)
    du_dz = _SQRT_2_OVER_PI * (1.0 + 3.0 * _GELU_C * z2)
    dgelu = 0.5 * (1.0 + t) + 0.5 * z * (1.0 - t * t) * du_dz
    return gelu, dgelu


def linearized_mlp_kernel(
    x_ref,      # [TB, Din_p]
    w1cat_ref,  # [Din_p, 2*H_p]   = [w10 | dw1]
    b1cat_ref,  # [1, 2*H_p]       = [b10 | db1]
    w2sum_ref,  # [H_p, Dout_p]    = w20 + dw2  (== current w2)
    w20_ref,    # [H_p, Dout_p]    = w20
    b2_ref,     # [1, Dout_p]      = b20 + db2  (== current b2)
    out_ref,    # [TB, Dout_p]
):
    x = x_ref[...]

    # ---- fused layer-1 primal + tangent: one MXU matmul over N = 2*H_p ----
    z_all = (jnp.dot(x, w1cat_ref[...], preferred_element_type=jnp.float32)
             + b1cat_ref[...].astype(jnp.float32))                 # [TB, 2H_p] f32
    H = z_all.shape[-1] // 2
    z1 = z_all[:, :H]                                              # primal pre-act
    dz1 = z_all[:, H:]                                             # tangent pre-act

    # ---- GELU + analytic derivative (f32 elementwise) ----
    h, dgelu = _gelu_and_grad(z1)
    dh = dgelu * dz1

    # ---- concat-free layer-2: out0 + dp = h@(w20+dw2) + dh@w20 + (b20+db2) ----
    out = jnp.dot(h.astype(w2sum_ref.dtype), w2sum_ref[...],
                  preferred_element_type=jnp.float32)
    out = out + jnp.dot(dh.astype(w20_ref.dtype), w20_ref[...],
                        preferred_element_type=jnp.float32)
    out = out + b2_ref[...].astype(jnp.float32)

    out_ref[...] = out.astype(out_ref.dtype)


def _vmem_budget_bytes():
    """Per-core VMEM budget with ~15% headroom; clamped to [32 MiB, 112 MiB]."""
    try:
        cap = int(pltpu.get_tpu_info().vmem_capacity_bytes)
    except Exception:
        cap = 64 * 2**20  # conservative default (v7x per-TC VMEM)
    return int(min(max(int(cap * 0.85), 32 * 2**20), 112 * 2**20))


def linearized_mlp_forward(x, params0, params, *, max_tb=1024):
    """Pallas-backed equivalent of LinearizedModelWraper.forward for the MLP model.

    params0 / params are dicts with keys 'w1' [H, Din], 'b1' [H], 'w2' [Dout, H],
    'b2' [Dout] (PyTorch nn.Linear layout).  Param prep (transpose / delta / concat /
    zero-padding) is one-time plain-JAX glue; all per-token compute is in the kernel.
    """
    B, Din = x.shape
    H = params0["w1"].shape[0]
    Dout = params0["w2"].shape[0]
    dtype = x.dtype
    isz = jnp.dtype(dtype).itemsize

    # --- pad dims for MXU / lane alignment ---
    Din_p = _round_up(Din, 128)
    H_p = _round_up(H, 128)
    Dout_p = _round_up(Dout, 128)

    # --- one-time wrapper-side param prep (transpose to [in, out], deltas, fuse) ---
    def pad2(a, r, c):
        return jnp.pad(a, ((0, r - a.shape[0]), (0, c - a.shape[1])))

    w10 = pad2(params0["w1"].T, Din_p, H_p)
    dw1 = pad2((params["w1"] - params0["w1"]).T, Din_p, H_p)
    w1cat = jnp.concatenate([w10, dw1], axis=1).astype(dtype)            # [Din_p, 2H_p]

    b10 = jnp.pad(params0["b1"], (0, H_p - H))
    db1 = jnp.pad(params["b1"] - params0["b1"], (0, H_p - H))
    b1cat = jnp.concatenate([b10, db1]).reshape(1, 2 * H_p).astype(dtype)

    # layer-2 split form:  h@(w20+dw2) + dh@w20 + (b20+db2).  Note w20+dw2 == current w2.
    w2sum = pad2(params["w2"].T, H_p, Dout_p).astype(dtype)              # [H_p, Dout_p]
    w20 = pad2(params0["w2"].T, H_p, Dout_p).astype(dtype)               # [H_p, Dout_p]
    b2row = jnp.pad(params["b2"], (0, Dout_p - Dout)).reshape(1, Dout_p).astype(dtype)

    weight_bytes = (w1cat.size + b1cat.size + w2sum.size + w20.size + b2row.size) * isz

    # --- VMEM-budget-driven batch tile ---
    budget = _vmem_budget_bytes()
    # per-row cost: double-buffered x/out tiles + live f32 intermediates (z_all is 2H_p
    # wide; h/dgelu/dh/out accumulators; generous 12*H_p estimate).
    row_bytes = 2 * (Din_p + Dout_p) * isz + (12 * H_p + 2 * Dout_p) * 4
    # conservative: assume weights end up double-buffered even if Buffered(1) is granted
    avail = budget - 2 * weight_bytes
    if avail < 8 * row_bytes:
        # TODO(synk): add a weight-tiled fallback (extra "arbitrary" grid axes over
        # 2*H_p / Dout_p with a VMEM f32 accumulator + pl.when init/finalize) for models
        # whose resident weights exceed the per-core VMEM budget.
        raise ValueError(
            f"resident weights ({weight_bytes / 2**20:.1f} MiB) do not fit the VMEM "
            f"budget ({budget / 2**20:.1f} MiB); weight-tiled path not implemented")

    tb_cap = int(min(max_tb, max(8, (avail // row_bytes) // 8 * 8)))
    n_tiles = _cdiv(B, tb_cap)
    if n_tiles < 2 and B >= 16:
        n_tiles = 2   # v7x megacore: >= 2 grid steps so "parallel" spans both TCs
    TB = _round_up(_cdiv(B, n_tiles), 8)
    B_p = n_tiles * TB

    # pad x only when needed (avoids a full extra HBM pass for already-aligned inputs)
    if B_p != B or Din_p != Din:
        x_p = jnp.pad(x, ((0, B_p - B), (0, Din_p - Din)))
    else:
        x_p = x

    vmem_limit = int(budget)

    cost = pl.CostEstimate(
        flops=2 * B_p * Din_p * (2 * H_p) + 2 * B_p * (2 * H_p) * Dout_p,
        transcendentals=B_p * H_p,
        bytes_accessed=(x_p.size + w1cat.size + b1cat.size + w2sum.size + w20.size
                        + b2row.size) * isz + B_p * Dout_p * isz,
    )

    def _call(single_buffer_weights):
        def wspec(shape):
            kwargs = {}
            if single_buffer_weights:
                # constant block index -> no need to double-buffer resident weights
                kwargs["pipeline_mode"] = pl.Buffered(1)
            return pl.BlockSpec(shape, lambda i: (0,) * len(shape), **kwargs)

        return pl.pallas_call(
            linearized_mlp_kernel,
            out_shape=jax.ShapeDtypeStruct((B_p, Dout_p), dtype),
            grid=(n_tiles,),
            in_specs=[
                pl.BlockSpec((TB, Din_p), lambda i: (i, 0)),   # x: batch-tiled
                wspec((Din_p, 2 * H_p)),                       # weights stay resident
                wspec((1, 2 * H_p)),
                wspec((H_p, Dout_p)),
                wspec((H_p, Dout_p)),
                wspec((1, Dout_p)),
            ],
            out_specs=pl.BlockSpec((TB, Dout_p), lambda i: (i, 0)),
            compiler_params=pltpu.CompilerParams(
                dimension_semantics=("parallel",),
                vmem_limit_bytes=vmem_limit,
            ),
            cost_estimate=cost,
        )(x_p, w1cat, b1cat, w2sum, w20, b2row)

    try:
        out_p = jax.block_until_ready(_call(True))
    except Exception:
        # jax version / lowering path that rejects single-buffering: use defaults
        out_p = _call(False)

    return out_p[:B, :Dout]


# ------------------------- pure-JAX reference -------------------------
def _mlp_apply(params, x):
    z1 = x @ params["w1"].T + params["b1"]
    h = jax.nn.gelu(z1, approximate=True)
    return h @ params["w2"].T + params["b2"]


def _linearized_ref(x, params0, params):
    dparams = jax.tree_util.tree_map(lambda p, p0: p - p0, params, params0)
    out, dp = jax.jvp(lambda p: _mlp_apply(p, x), (params0,), (dparams,))
    return out + dp


if __name__ == "__main__":
    key = jax.random.PRNGKey(0)
    B, Din, H, Dout = 8, 32, 64, 16

    keys = jax.random.split(key, 9)
    x = jax.random.normal(keys[0], (B, Din), dtype=jnp.float32)

    # theta0 (frozen init params) and theta (current fine-tuned params)
    params0 = {
        "w1": jax.random.normal(keys[1], (H, Din), dtype=jnp.float32) * 0.1,
        "b1": jax.random.normal(keys[2], (H,), dtype=jnp.float32) * 0.1,
        "w2": jax.random.normal(keys[3], (Dout, H), dtype=jnp.float32) * 0.1,
        "b2": jax.random.normal(keys[4], (Dout,), dtype=jnp.float32) * 0.1,
    }
    params = {
        "w1": params0["w1"] + jax.random.normal(keys[5], (H, Din), dtype=jnp.float32) * 0.05,
        "b1": params0["b1"] + jax.random.normal(keys[6], (H,), dtype=jnp.float32) * 0.05,
        "w2": params0["w2"] + jax.random.normal(keys[7], (Dout, H), dtype=jnp.float32) * 0.05,
        "b2": params0["b2"] + jax.random.normal(keys[8], (Dout,), dtype=jnp.float32) * 0.05,
    }

    out = linearized_mlp_forward(x, params0, params)
    out = jax.block_until_ready(out)

    ref = _linearized_ref(x, params0, params)
    assert out.shape == (B, Dout)
    assert jnp.allclose(out, ref, atol=1e-4, rtol=1e-4), "mismatch vs. JAX jvp reference"

    print("KERNEL_OK")
</pallas_src>

<mosaic_0001>
module attributes {stable_mosaic.version = 11 : i64} {
  func.func @linearized_mlp_kernel(%arg0: i32, %arg1: memref<8x128xf32, #tpu.memory_space<vmem>>, %arg2: memref<128x256xf32, #tpu.memory_space<vmem>>, %arg3: memref<1x256xf32, #tpu.memory_space<vmem>>, %arg4: memref<128x128xf32, #tpu.memory_space<vmem>>, %arg5: memref<128x128xf32, #tpu.memory_space<vmem>>, %arg6: memref<1x128xf32, #tpu.memory_space<vmem>>, %arg7: memref<8x128xf32, #tpu.memory_space<vmem>>) attributes {dimension_semantics = [#tpu.dimension_semantics<parallel>], iteration_bounds = array<i64: 1>, scalar_prefetch = 0 : i64, scratch_operands = 0 : i64, tpu.core_type = #tpu.core_type<tc>, window_params = [{transform_indices = @transform_0, window_bounds = array<i64: 8, 128>}, {pipeline_mode = #tpu.pipeline_mode<synchronous>, transform_indices = @transform_1, window_bounds = array<i64: 128, 256>}, {pipeline_mode = #tpu.pipeline_mode<synchronous>, transform_indices = @transform_2, window_bounds = array<i64: 1, 256>}, {pipeline_mode = #tpu.pipeline_mode<synchronous>, transform_indices = @transform_3, window_bounds = array<i64: 128, 128>}, {pipeline_mode = #tpu.pipeline_mode<synchronous>, transform_indices = @transform_4, window_bounds = array<i64: 128, 128>}, {pipeline_mode = #tpu.pipeline_mode<synchronous>, transform_indices = @transform_5, window_bounds = array<i64: 1, 128>}, {transform_indices = @transform_6, window_bounds = array<i64: 8, 128>}]} {
    %c0 = arith.constant 0 : index
    %c0_0 = arith.constant 0 : index
    %0 = vector.load %arg1[%c0, %c0_0] : memref<8x128xf32, #tpu.memory_space<vmem>>, vector<8x128xf32>
    %c0_1 = arith.constant 0 : index
    %c0_2 = arith.constant 0 : index
    %1 = vector.load %arg2[%c0_1, %c0_2] : memref<128x256xf32, #tpu.memory_space<vmem>>, vector<128x256xf32>
    %cst = arith.constant dense<0.000000e+00> : vector<8x256xf32>
    %2 = tpu.matmul %0, %1, %cst {dimension_numbers = #tpu.dot_dimension_numbers<[1], [0], [0], [1], [0, 0, 1, 1], [], []>} : vector<8x128xf32>, vector<128x256xf32>, vector<8x256xf32> -> vector<8x256xf32>
    %c0_3 = arith.constant 0 : index
    %c0_4 = arith.constant 0 : index
    %3 = vector.load %arg3[%c0_3, %c0_4] : memref<1x256xf32, #tpu.memory_space<vmem>>, vector<1x256xf32>
    %4 = vector.broadcast %3 : vector<1x256xf32> to vector<8x256xf32>
    %5 = arith.addf %2, %4 : vector<8x256xf32>
    %6 = vector.extract_strided_slice %5 {offsets = [0, 0], sizes = [8, 128], strides = [1, 1]} : vector<8x256xf32> to vector<8x128xf32>
    %7 = vector.extract_strided_slice %5 {offsets = [0, 128], sizes = [8, 128], strides = [1, 1]} : vector<8x256xf32> to vector<8x128xf32>
    %8 = arith.mulf %6, %6 : vector<8x128xf32>
    %cst_5 = arith.constant 4.471500e-02 : f32
    %9 = vector.broadcast %cst_5 : f32 to vector<8x128xf32>
    %10 = arith.mulf %9, %8 : vector<8x128xf32>
    %11 = arith.mulf %10, %6 : vector<8x128xf32>
    %12 = arith.addf %6, %11 : vector<8x128xf32>
    %cst_6 = arith.constant 0.797884583 : f32
    %13 = vector.broadcast %cst_6 : f32 to vector<8x128xf32>
    %14 = arith.mulf %13, %12 : vector<8x128xf32>
    %15 = math.tanh %14 : vector<8x128xf32>
    %cst_7 = arith.constant 5.000000e-01 : f32
    %16 = vector.broadcast %cst_7 : f32 to vector<8x128xf32>
    %17 = arith.mulf %16, %6 : vector<8x128xf32>
    %cst_8 = arith.constant 1.000000e+00 : f32
    %18 = vector.broadcast %cst_8 : f32 to vector<8x128xf32>
    %19 = arith.addf %18, %15 : vector<8x128xf32>
    %20 = arith.mulf %17, %19 : vector<8x128xf32>
    %cst_9 = arith.constant 1.341450e-01 : f32
    %21 = vector.broadcast %cst_9 : f32 to vector<8x128xf32>
    %22 = arith.mulf %21, %8 : vector<8x128xf32>
    %cst_10 = arith.constant 1.000000e+00 : f32
    %23 = vector.broadcast %cst_10 : f32 to vector<8x128xf32>
    %24 = arith.addf %23, %22 : vector<8x128xf32>
    %cst_11 = arith.constant 0.797884583 : f32
    %25 = vector.broadcast %cst_11 : f32 to vector<8x128xf32>
    %26 = arith.mulf %25, %24 : vector<8x128xf32>
    %cst_12 = arith.constant 1.000000e+00 : f32
    %27 = vector.broadcast %cst_12 : f32 to vector<8x128xf32>
    %28 = arith.addf %27, %15 : vector<8x128xf32>
    %cst_13 = arith.constant 5.000000e-01 : f32
    %29 = vector.broadcast %cst_13 : f32 to vector<8x128xf32>
    %30 = arith.mulf %29, %28 : vector<8x128xf32>
    %cst_14 = arith.constant 5.000000e-01 : f32
    %31 = vector.broadcast %cst_14 : f32 to vector<8x128xf32>
    %32 = arith.mulf %31, %6 : vector<8x128xf32>
    %33 = arith.mulf %15, %15 : vector<8x128xf32>
    %cst_15 = arith.constant 1.000000e+00 : f32
    %34 = vector.broadcast %cst_15 : f32 to vector<8x128xf32>
    %35 = arith.subf %34, %33 : vector<8x128xf32>
    %36 = arith.mulf %32, %35 : vector<8x128xf32>
    %37 = arith.mulf %36, %26 : vector<8x128xf32>
    %38 = arith.addf %30, %37 : vector<8x128xf32>
    %39 = arith.mulf %38, %7 : vector<8x128xf32>
    %c0_16 = arith.constant 0 : index
    %c0_17 = arith.constant 0 : index
    %40 = vector.load %arg4[%c0_16, %c0_17] : memref<128x128xf32, #tpu.memory_space<vmem>>, vector<128x128xf32>
    %cst_18 = arith.constant dense<0.000000e+00> : vector<8x128xf32>
    %41 = tpu.matmul %20, %40, %cst_18 {dimension_numbers = #tpu.dot_dimension_numbers<[1], [0], [0], [1], [0, 0, 1, 1], [], []>} : vector<8x128xf32>, vector<128x128xf32>, vector<8x128xf32> -> vector<8x128xf32>
    %c0_19 = arith.constant 0 : index
    %c0_20 = arith.constant 0 : index
    %42 = vector.load %arg5[%c0_19, %c0_20] : memref<128x128xf32, #tpu.memory_space<vmem>>, vector<128x128xf32>
    %cst_21 = arith.constant dense<0.000000e+00> : vector<8x128xf32>
    %43 = tpu.matmul %39, %42, %cst_21 {dimension_numbers = #tpu.dot_dimension_numbers<[1], [0], [0], [1], [0, 0, 1, 1], [], []>} : vector<8x128xf32>, vector<128x128xf32>, vector<8x128xf32> -> vector<8x128xf32>
    %44 = arith.addf %41, %43 : vector<8x128xf32>
    %c0_22 = arith.constant 0 : index
    %c0_23 = arith.constant 0 : index
    %45 = vector.load %arg6[%c0_22, %c0_23] : memref<1x128xf32, #tpu.memory_space<vmem>>, vector<1x128xf32>
    %46 = vector.broadcast %45 : vector<1x128xf32> to vector<8x128xf32>
    %47 = arith.addf %44, %46 : vector<8x128xf32>
    %c0_24 = arith.constant 0 : index
    %c0_25 = arith.constant 0 : index
    %48 = vector.load %arg7[%c0_24, %c0_25] : memref<8x128xf32, #tpu.memory_space<vmem>>, vector<8x128xf32>
    tpu.vector_store %arg7[%c0_24, %c0_25], %47 {strides = array<i32>} : memref<8x128xf32, #tpu.memory_space<vmem>>, vector<8x128xf32>,
    return
  }
  func.func @transform_0(%arg0: i32) -> (i32, i32) {
    %c0_i32 = arith.constant 0 : i32
    %c0_i32_0 = arith.constant 0 : i32
    return %arg0, %c0_i32 : i32, i32
  }
  func.func @transform_1(%arg0: i32) -> (i32, i32) {
    %c0_i32 = arith.constant 0 : i32
    %c0_i32_0 = arith.constant 0 : i32
    %c0_i32_1 = arith.constant 0 : i32
    return %c0_i32, %c0_i32_0 : i32, i32
  }
  func.func @transform_2(%arg0: i32) -> (i32, i32) {
    %c0_i32 = arith.constant 0 : i32
    %c0_i32_0 = arith.constant 0 : i32
    %c0_i32_1 = arith.constant 0 : i32
    return %c0_i32, %c0_i32_0 : i32, i32
  }
  func.func @transform_3(%arg0: i32) -> (i32, i32) {
    %c0_i32 = arith.constant 0 : i32
    %c0_i32_0 = arith.constant 0 : i32
    %c0_i32_1 = arith.constant 0 : i32
    return %c0_i32, %c0_i32_0 : i32, i32
  }
  func.func @transform_4(%arg0: i32) -> (i32, i32) {
    %c0_i32 = arith.constant 0 : i32
    %c0_i32_0 = arith.constant 0 : i32
    %c0_i32_1 = arith.constant 0 : i32
    return %c0_i32, %c0_i32_0 : i32, i32
  }
  func.func @transform_5(%arg0: i32) -> (i32, i32) {
    %c0_i32 = arith.constant 0 : i32
    %c0_i32_0 = arith.constant 0 : i32
    %c0_i32_1 = arith.constant 0 : i32
    return %c0_i32, %c0_i32_0 : i32, i32
  }
  func.func @transform_6(%arg0: i32) -> (i32, i32) {
    %c0_i32 = arith.constant 0 : i32
    %c0_i32_0 = arith.constant 0 : i32
    return %arg0, %c0_i32 : i32, i32
  }
}

module attributes {stable_mosaic.version = 11 : i64} {
  func.func @linearized_mlp_kernel(%arg0: i32, %arg1: memref<8x128xf32, #tpu.memory_space<vmem>>, %arg2: memref<128x256xf32, #tpu.memory_space<vmem>>, %arg3: memref<1x256xf32, #tpu.memory_space<vmem>>, %arg4: memref<128x128xf32, #tpu.memory_space<vmem>>, %arg5: memref<128x128xf32, #tpu.memory_space<vmem>>, %arg6: memref<1x128xf32, #tpu.memory_space<vmem>>, %arg7: memref<8x128xf32, #tpu.memory_space<vmem>>) attributes {dimension_semantics = [#tpu.dimension_semantics<parallel>], iteration_bounds = array<i64: 1>, scalar_prefetch = 0 : i64, scratch_operands = 0 : i64, tpu.core_type = #tpu.core_type<tc>, window_params = [{transform_indices = @transform_0, window_bounds = array<i64: 8, 128>}, {pipeline_mode = #tpu.pipeline_mode<synchronous>, transform_indices = @transform_1, window_bounds = array<i64: 128, 256>}, {pipeline_mode = #tpu.pipeline_mode<synchronous>, transform_indices = @transform_2, window_bounds = array<i64: 1, 256>}, {pipeline_mode = #tpu.pipeline_mode<synchronous>, transform_indices = @transform_3, window_bounds = array<i64: 128, 128>}, {pipeline_mode = #tpu.pipeline_mode<synchronous>, transform_indices = @transform_4, window_bounds = array<i64: 128, 128>}, {pipeline_mode = #tpu.pipeline_mode<synchronous>, transform_indices = @transform_5, window_bounds = array<i64: 1, 128>}, {transform_indices = @transform_6, window_bounds = array<i64: 8, 128>}]} {
    %c0 = arith.constant 0 : index
    %c0_0 = arith.constant 0 : index
    %0 = vector.load %arg1[%c0, %c0_0] : memref<8x128xf32, #tpu.memory_space<vmem>>, vector<8x128xf32>
    %c0_1 = arith.constant 0 : index
    %c0_2 = arith.constant 0 : index
    %1 = vector.load %arg2[%c0_1, %c0_2] : memref<128x256xf32, #tpu.memory_space<vmem>>, vector<128x256xf32>
    %cst = arith.constant dense<0.000000e+00> : vector<8x256xf32>
    %2 = tpu.matmul %0, %1, %cst {dimension_numbers = #tpu.dot_dimension_numbers<[1], [0], [0], [1], [0, 0, 1, 1], [], []>} : vector<8x128xf32>, vector<128x256xf32>, vector<8x256xf32> -> vector<8x256xf32>
    %c0_3 = arith.constant 0 : index
    %c0_4 = arith.constant 0 : index
    %3 = vector.load %arg3[%c0_3, %c0_4] : memref<1x256xf32, #tpu.memory_space<vmem>>, vector<1x256xf32>
    %4 = vector.broadcast %3 : vector<1x256xf32> to vector<8x256xf32>
    %5 = arith.addf %2, %4 : vector<8x256xf32>
    %6 = vector.extract_strided_slice %5 {offsets = [0, 0], sizes = [8, 128], strides = [1, 1]} : vector<8x256xf32> to vector<8x128xf32>
    %7 = vector.extract_strided_slice %5 {offsets = [0, 128], sizes = [8, 128], strides = [1, 1]} : vector<8x256xf32> to vector<8x128xf32>
    %8 = arith.mulf %6, %6 : vector<8x128xf32>
    %cst_5 = arith.constant 4.471500e-02 : f32
    %9 = vector.broadcast %cst_5 : f32 to vector<8x128xf32>
    %10 = arith.mulf %9, %8 : vector<8x128xf32>
    %11 = arith.mulf %10, %6 : vector<8x128xf32>
    %12 = arith.addf %6, %11 : vector<8x128xf32>
    %cst_6 = arith.constant 0.797884583 : f32
    %13 = vector.broadcast %cst_6 : f32 to vector<8x128xf32>
    %14 = arith.mulf %13, %12 : vector<8x128xf32>
    %15 = math.tanh %14 : vector<8x128xf32>
    %cst_7 = arith.constant 5.000000e-01 : f32
    %16 = vector.broadcast %cst_7 : f32 to vector<8x128xf32>
    %17 = arith.mulf %16, %6 : vector<8x128xf32>
    %cst_8 = arith.constant 1.000000e+00 : f32
    %18 = vector.broadcast %cst_8 : f32 to vector<8x128xf32>
    %19 = arith.addf %18, %15 : vector<8x128xf32>
    %20 = arith.mulf %17, %19 : vector<8x128xf32>
    %cst_9 = arith.constant 1.341450e-01 : f32
    %21 = vector.broadcast %cst_9 : f32 to vector<8x128xf32>
    %22 = arith.mulf %21, %8 : vector<8x128xf32>
    %cst_10 = arith.constant 1.000000e+00 : f32
    %23 = vector.broadcast %cst_10 : f32 to vector<8x128xf32>
    %24 = arith.addf %23, %22 : vector<8x128xf32>
    %cst_11 = arith.constant 0.797884583 : f32
    %25 = vector.broadcast %cst_11 : f32 to vector<8x128xf32>
    %26 = arith.mulf %25, %24 : vector<8x128xf32>
    %cst_12 = arith.constant 1.000000e+00 : f32
    %27 = vector.broadcast %cst_12 : f32 to vector<8x128xf32>
    %28 = arith.addf %27, %15 : vector<8x128xf32>
    %cst_13 = arith.constant 5.000000e-01 : f32
    %29 = vector.broadcast %cst_13 : f32 to vector<8x128xf32>
    %30 = arith.mulf %29, %28 : vector<8x128xf32>
    %cst_14 = arith.constant 5.000000e-01 : f32
    %31 = vector.broadcast %cst_14 : f32 to vector<8x128xf32>
    %32 = arith.mulf %31, %6 : vector<8x128xf32>
    %33 = arith.mulf %15, %15 : vector<8x128xf32>
    %cst_15 = arith.constant 1.000000e+00 : f32
    %34 = vector.broadcast %cst_15 : f32 to vector<8x128xf32>
    %35 = arith.subf %34, %33 : vector<8x128xf32>
    %36 = arith.mulf %32, %35 : vector<8x128xf32>
    %37 = arith.mulf %36, %26 : vector<8x128xf32>
    %38 = arith.addf %30, %37 : vector<8x128xf32>
    %39 = arith.mulf %38, %7 : vector<8x128xf32>
    %c0_16 = arith.constant 0 : index
    %c0_17 = arith.constant 0 : index
    %40 = vector.load %arg4[%c0_16, %c0_17] : memref<128x128xf32, #tpu.memory_space<vmem>>, vector<128x128xf32>
    %cst_18 = arith.constant dense<0.000000e+00> : vector<8x128xf32>
    %41 = tpu.matmul %20, %40, %cst_18 {dimension_numbers = #tpu.dot_dimension_numbers<[1], [0], [0], [1], [0, 0, 1, 1], [], []>} : vector<8x128xf32>, vector<128x128xf32>, vector<8x128xf32> -> vector<8x128xf32>
    %c0_19 = arith.constant 0 : index
    %c0_20 = arith.constant 0 : index
    %42 = vector.load %arg5[%c0_19, %c0_20] : memref<128x128xf32, #tpu.memory_space<vmem>>, vector<128x128xf32>
    %cst_21 = arith.constant dense<0.000000e+00> : vector<8x128xf32>
    %43 = tpu.matmul %39, %42, %cst_21 {dimension_numbers = #tpu.dot_dimension_numbers<[1], [0], [0], [1], [0, 0, 1, 1], [], []>} : vector<8x128xf32>, vector<128x128xf32>, vector<8x128xf32> -> vector<8x128xf32>
    %44 = arith.addf %41, %43 : vector<8x128xf32>
    %c0_22 = arith.constant 0 : index
    %c0_23 = arith.constant 0 : index
    %45 = vector.load %arg6[%c0_22, %c0_23] : memref<1x128xf32, #tpu.memory_space<vmem>>, vector<1x128xf32>
    %46 = vector.broadcast %45 : vector<1x128xf32> to vector<8x128xf32>
    %47 = arith.addf %44, %46 : vector<8x128xf32>
    %c0_24 = arith.constant 0 : index
    %c0_25 = arith.constant 0 : index
    %48 = vector.load %arg7[%c0_24, %c0_25] : memref<8x128xf32, #tpu.memory_space<vmem>>, vector<8x128xf32>
    tpu.vector_store %arg7[%c0_24, %c0_25], %47 {strides = array<i32>} : memref<8x128xf32, #tpu.memory_space<vmem>>, vector<8x128xf32>,
    return
  }
  func.func @transform_0(%arg0: i32) -> (i32, i32) {
    %c0_i32 = arith.constant 0 : i32
    %c0_i32_0 = arith.constant 0 : i32
    return %arg0, %c0_i32 : i32, i32
  }
  func.func @transform_1(%arg0: i32) -> (i32, i32) {
    %c0_i32 = arith.constant 0 : i32
    %c0_i32_0 = arith.constant 0 : i32
    %c0_i32_1 = arith.constant 0 : i32
    return %c0_i32, %c0_i32_0 : i32, i32
  }
  func.func @transform_2(%arg0: i32) -> (i32, i32) {
    %c0_i32 = arith.constant 0 : i32
    %c0_i32_0 = arith.constant 0 : i32
    %c0_i32_1 = arith.constant 0 : i32
    return %c0_i32, %c0_i32_0 : i32, i32
  }
  func.func @transform_3(%arg0: i32) -> (i32, i32) {
    %c0_i32 = arith.constant 0 : i32
    %c0_i32_0 = arith.constant 0 : i32
    %c0_i32_1 = arith.constant 0 : i32
    return %c0_i32, %c0_i32_0 : i32, i32
  }
  func.func @transform_4(%arg0: i32) -> (i32, i32) {
    %c0_i32 = arith.constant 0 : i32
    %c0_i32_0 = arith.constant 0 : i32
    %c0_i32_1 = arith.constant 0 : i32
    return %c0_i32, %c0_i32_0 : i32, i32
  }
  func.func @transform_5(%arg0: i32) -> (i32, i32) {
    %c0_i32 = arith.constant 0 : i32
    %c0_i32_0 = arith.constant 0 : i32
    %c0_i32_1 = arith.constant 0 : i32
    return %c0_i32, %c0_i32_0 : i32, i32
  }
  func.func @transform_6(%arg0: i32) -> (i32, i32) {
    %c0_i32 = arith.constant 0 : i32
    %c0_i32_0 = arith.constant 0 : i32
    return %arg0, %c0_i32 : i32, i32
  }
}

</mosaic_0001>

<bundles_post_ra>
// kernel: tpu_custom_call.1
= control target key start
LH: loop header
LB: loop body
LE: loop exit
PB: predicated region body
PF: predicated region fallthrough
CT: control target
= control target key end

     0   :  { %11 = vsyncpa [#allocation3], 0  ;;  %s738_s0 = inlined_call_operand.hbm [shape: f32[8,128], index: 0, kind: input, shape index: {}]   ;;  %s739_s1 = inlined_call_operand.hbm [shape: f32[128,256], index: 1, kind: input, shape index: {}]   ;;  %s740_s2 = inlined_call_operand.vmem [shape: f32[1,256], index: 2, kind: input, shape index: {}]   ;;  %s741_s3 = inlined_call_operand.hbm [shape: f32[128,128], index: 3, kind: input, shape index: {}]   ;;  %s742_s4 = inlined_call_operand.hbm [shape: f32[128,128], index: 4, kind: input, shape index: {}]   ;;  %s743_s5 = inlined_call_operand.vmem [shape: f32[1,128], index: 5, kind: input, shape index: {}]   ;;  %s744_s6 = inlined_call_operand.hbm [shape: f32[8,128], index: 6, kind: output, shape index: {}]  }
   0x1   :  { %12 = vsyncpa [#allocation6], 0 }
   0x2   :  { %13 = vsyncpa [#allocation9], 0 }
   0x3   :  { %14 = vsyncpa [#allocation4], 0  ;;  %s636_s21 = smov [#allocation5]  }
   0x4   :  { %s30_s22 = sshll.u32 %s636_s21, 4  ;;  %s31_s22 = int_to_ptr.vmem [resolvable:$true] %s30_s22 }
   0x5   :  { %s536_s23 = scalar_lea.vmem %s31_s22, 4096  ;;  %p541_p1 = scmp.lt.s32.totalorder %s31_s22, %s31_s22 }
   0x6   :  { %p537_p0 = scmp.ne.s32.totalorder %s31_s22, %s536_s23  ;;  %p542_p2 = scmp.lt.s32.totalorder %s536_s23, %s536_s23 }
   0x8   :  { %p543_p3 = por %p542_p2, %p541_p1 }
   0xa   :  { %p544_p4 = pnand %p543_p3, %p537_p0 }
   0xc   :  { %547 = shalt.err (!%p544_p4)
}
   0xd   :  { %s637_s24 = smov 256   ;;  %s638_s25 = smov 16  }
   0xe   :  { %36 = dma.hbm_to_vmem [thread:$0]  %s739_s1, 4096, %s31_s22, [#allocation6], %s637_s24, %s637_s24, %s638_s25  }
   0xf   :  { %s639_s28 = smov [#allocation2]   ;;  %s640_s30 = smov [#allocation7]  }
  0x10   :  { %s21_s29 = sshll.u32 %s639_s28, 4  ;;  %s44_s7 = sshll.u32 %s640_s30, 4  ;;  %s22_s29 = int_to_ptr.vmem [resolvable:$true] %s21_s29  ;;  %s45_s7 = int_to_ptr.vmem [resolvable:$true] %s44_s7 }
  0x11   :  { %s556_s8 = scalar_lea.vmem %s22_s29, 128  ;;  %p561_p6 = scmp.lt.s32.totalorder %s22_s29, %s22_s29 }
  0x12   :  { %p557_p5 = scmp.ne.s32.totalorder %s22_s29, %s556_s8  ;;  %p562_p7 = scmp.lt.s32.totalorder %s556_s8, %s556_s8 }
  0x14   :  { %p563_p8 = por %p562_p7, %p561_p6 }
  0x16   :  { %p564_p9 = pnand %p563_p8, %p557_p5 }
  0x18   :  { %567 = shalt.err (!%p564_p9)
}
  0x19   :  { %24 = dma.hbm_to_vmem [thread:$0]  %s738_s0, 128, %s22_s29, [#allocation3]  }
  0x1a   :  { %s576_s11 = scalar_lea.vmem %s45_s7, 2048  ;;  %p581_p11 = scmp.lt.s32.totalorder %s45_s7, %s45_s7 }
  0x1b   :  { %p577_p10 = scmp.ne.s32.totalorder %s45_s7, %s576_s11  ;;  %p582_p12 = scmp.lt.s32.totalorder %s576_s11, %s576_s11 }
  0x1d   :  { %p583_p13 = por %p582_p12, %p581_p11 }
  0x1f   :  { %p584_p0 = pnand %p583_p13, %p577_p10 }
  0x21   :  { %587 = shalt.err (!%p584_p0)
}
  0x22   :  { %s641_s1 = smov 128   ;;  %s642_s12 = smov 8  }
  0x23   :  { %50 = dma.hbm_to_vmem [thread:$0]  %s741_s3, 2048, %s45_s7, [#allocation6], %s641_s1, %s641_s1, %s642_s12  }
  0x24   :  { %s643_s15 = smov [#allocation8]  }
  0x25   :  { %s56_s16 = sshll.u32 %s643_s15, 4  ;;  %s57_s16 = int_to_ptr.vmem [resolvable:$true] %s56_s16 }
  0x26   :  { %s596_s17 = scalar_lea.vmem %s57_s16, 2048  ;;  %p601_p2 = scmp.lt.s32.totalorder %s57_s16, %s57_s16 }
  0x27   :  { %p597_p1 = scmp.ne.s32.totalorder %s57_s16, %s596_s17  ;;  %p602_p3 = scmp.lt.s32.totalorder %s596_s17, %s596_s17 }
  0x29   :  { %p603_p4 = por %p602_p3, %p601_p2 }
  0x2b   :  { %p604_p5 = pnand %p603_p4, %p597_p1 }
  0x2d   :  { %607 = shalt.err (!%p604_p5)
}
  0x2e   :  { %62 = dma.hbm_to_vmem [thread:$0]  %s742_s4, 2048, %s57_s16, [#allocation9], %s641_s1, %s641_s1, %s642_s12  }
  0x2f   :  { %628 = dma.done.wait [#allocation3], 128  }
  0x30   :  { %629 = vsyncadd [#allocation3], 4294967168 }
  0x31   :  { %630 = dma.done.wait [#allocation6], 6144  }
  0x32   :  { %631 = vsyncadd [#allocation6], 4294961152 }
  0x33   :  { %632 = dma.done.wait [#allocation9], 2048  }
  0x34   :  { %633 = vsyncadd [#allocation9], 4294965248  ;;  %v644_v0 = vmov 0.0   ;;  %v109_v1 = vld [vmem:[#allocation5 + $0xf8] sm:$0xff]  ;;  %v108_v2 = vld [vmem:[#allocation5 + $0xf0] sm:$0xff]  ;;  %vm645_vm0 = vmmov 0  }
  0x35   :  { %186 = vmatprep.mubr.f32.mxu0 %v644_v0  ;;  %445 = vmatprep.subr.mxu1 %v644_v0  ;;  %v107_v3 = vld [vmem:[#allocation5 + $0xe8] sm:$0xff]  ;;  %v106_v4 = vld [vmem:[#allocation5 + $0xe0] sm:$0xff]  ;;  %v105_v5 = vld [vmem:[#allocation5 + $0xd8] sm:$0xff]  ;;  %s646_s20 = smov [#allocation10]  }
  0x36   :  { %122 = vmatprep.subr.mxu0 %v109_v1  ;;  %v104_v6 = vld [vmem:[#allocation5 + $0xd0] sm:$0xff]  ;;  %v103_v7 = vld [vmem:[#allocation5 + $0xc8] sm:$0xff]  ;;  %v102_v8 = vld [vmem:[#allocation5 + $0xc0] sm:$0xff]  ;;  %477 = vmatprep.mubr.msk.f32.mxu1 %vm645_vm0, %v644_v0  ;;  %s399_s21 = sshll.u32 %s646_s20, 4  ;;  %s400_s21 = int_to_ptr.vmem [resolvable:$true] %s399_s21 }
  0x37   :  { %123 = vmatpush1.msra.mxu0 %v108_v2  ;;  %v101_v9 = vld [vmem:[#allocation5 + $0xb8] sm:$0xff]  ;;  %v100_v10 = vld [vmem:[#allocation5 + $0xb0] sm:$0xff]  ;;  %v99_v11 = vld [vmem:[#allocation5 + $0xa8] sm:$0xff]  ;;  %s608_s22 = scalar_lea.vmem %s400_s21, 128  ;;  %p613_p7 = scmp.lt.s32.totalorder %s400_s21, %s400_s21 }
  0x38   :  { %124 = vmatprep.subr.mxu0 %v107_v3  ;;  %v98_v12 = vld [vmem:[#allocation5 + $0xa0] sm:$0xff]  ;;  %v97_v13 = vld [vmem:[#allocation5 + $0x98] sm:$0xff]  ;;  %v96_v14 = vld [vmem:[#allocation5 + $0x90] sm:$0xff]  ;;  %v112_v3 = vlaneseq  ;;  %p609_p6 = scmp.ne.s32.totalorder %s400_s21, %s608_s22  ;;  %p614_p8 = scmp.lt.s32.totalorder %s608_s22, %s608_s22 }
  0x39   :  { %125 = vmatpush1.msra.mxu0 %v106_v4  ;;  %v95_v15 = vld [vmem:[#allocation5 + $0x88] sm:$0xff]  ;;  %v94_v16 = vld [vmem:[#allocation5 + $0x80] sm:$0xff]  ;;  %v93_v17 = vld [vmem:[#allocation5 + $0x78] sm:$0xff] }
  0x3a   :  { %126 = vmatprep.subr.mxu0 %v105_v5  ;;  %v92_v18 = vld [vmem:[#allocation5 + $0x70] sm:$0xff]  ;;  %v91_v19 = vld [vmem:[#allocation5 + $0x68] sm:$0xff]  ;;  %v90_v20 = vld [vmem:[#allocation5 + $0x60] sm:$0xff]  ;;  %v113_v4 = vshrl.u32 %v112_v3, 7  ;;  %p615_p9 = por %p614_p8, %p613_p7 }
  0x3b   :  { %127 = vmatpush1.msra.mxu0 %v104_v6  ;;  %v89_v21 = vld [vmem:[#allocation5 + $0x58] sm:$0xff]  ;;  %v88_v22 = vld [vmem:[#allocation5 + $0x50] sm:$0xff]  ;;  %v87_v23 = vld [vmem:[#allocation5 + $0x48] sm:$0xff] }
  0x3c   :  { %128 = vmatprep.subr.mxu0 %v103_v7  ;;  %v86_v24 = vld [vmem:[#allocation5 + $0x40] sm:$0xff]  ;;  %v85_v25 = vld [vmem:[#allocation5 + $0x38] sm:$0xff]  ;;  %v84_v26 = vld [vmem:[#allocation5 + $0x30] sm:$0xff]  ;;  %v114_v5 = vsub.s32 0, %v113_v4  ;;  %p616_p10 = pnand %p615_p9, %p609_p6 }
  0x3d   :  { %129 = vmatpush1.msra.mxu0 %v102_v8  ;;  %v83_v27 = vld [vmem:[#allocation5 + $0x28] sm:$0xff]  ;;  %v82_v28 = vld [vmem:[#allocation5 + $0x20] sm:$0xff]  ;;  %v81_v29 = vld [vmem:[#allocation5 + $0x18] sm:$0xff] }
  0x3e   :  { %130 = vmatprep.subr.mxu0 %v101_v9  ;;  %v80_v30 = vld [vmem:[#allocation5 + $0x10] sm:$0xff]  ;;  %v79_v31 = vld [vmem:[#allocation5 + $0x8] sm:$0xff]  ;;  %v78_v32 = vld [vmem:[#allocation5] sm:$0xff] }
  0x3f   :  { %131 = vmatpush1.msra.mxu0 %v100_v10  ;;  %v77_v33 = vld [vmem:[#allocation2] sm:$0xff]  ;;  %v226_v35 = vld [vmem:[#allocation7 + $0x70] sm:$0xff]  ;;  %v225_v36 = vld [vmem:[#allocation7 + $0x68] sm:$0xff] }
  0x40   :  { %132 = vmatprep.subr.mxu0 %v99_v11  ;;  %v227_v34 = vld [vmem:[#allocation7 + $0x78] sm:$0xff]  ;;  %v224_v37 = vld [vmem:[#allocation7 + $0x60] sm:$0xff]  ;;  %v242_v40 = vld [vmem:[#allocation8 + $0x70] sm:$0xff] }
  0x41   :  { %133 = vmatpush1.msra.mxu0 %v98_v12  ;;  %v243_v38 = vld [vmem:[#allocation8 + $0x78] sm:$0xff]  ;;  %v222_v41 = vld [vmem:[#allocation7 + $0x50] sm:$0xff]  ;;  %v241_v42 = vld [vmem:[#allocation8 + $0x68] sm:$0xff] }
  0x42   :  { %134 = vmatprep.subr.mxu0 %v97_v13  ;;  %v223_v39 = vld [vmem:[#allocation7 + $0x58] sm:$0xff]  ;;  %446 = vmatpush3.msra.mxu1 %v243_v38  ;;  %v221_v43 = vld [vmem:[#allocation7 + $0x48] sm:$0xff]  ;;  %v240_v44 = vld [vmem:[#allocation8 + $0x60] sm:$0xff] }
  0x43   :  { %135 = vmatpush1.msra.mxu0 %v96_v14  ;;  %447 = vmatprep.subr.mxu1 %v644_v0  ;;  %v220_v45 = vld [vmem:[#allocation7 + $0x40] sm:$0xff]  ;;  %v239_v46 = vld [vmem:[#allocation8 + $0x58] sm:$0xff]  ;;  %v238_v48 = vld [vmem:[#allocation8 + $0x50] sm:$0xff] }
  0x44   :  { %136 = vmatprep.subr.mxu0 %v95_v15  ;;  %448 = vmatpush3.msra.mxu1 %v242_v40  ;;  %v219_v47 = vld [vmem:[#allocation7 + $0x38] sm:$0xff]  ;;  %v218_v49 = vld [vmem:[#allocation7 + $0x30] sm:$0xff]  ;;  %v237_v50 = vld [vmem:[#allocation8 + $0x48] sm:$0xff] }
  0x45   :  { %137 = vmatpush1.msra.mxu0 %v94_v16  ;;  %449 = vmatprep.subr.mxu1 %v644_v0  ;;  %v217_v51 = vld [vmem:[#allocation7 + $0x28] sm:$0xff]  ;;  %v236_v52 = vld [vmem:[#allocation8 + $0x40] sm:$0xff]  ;;  %v235_v54 = vld [vmem:[#allocation8 + $0x38] sm:$0xff]  ;;  %v118_v16 = vsub.s32 1, %v113_v4 }
  0x46   :  { %138 = vmatprep.subr.mxu0 %v93_v17  ;;  %450 = vmatpush3.msra.mxu1 %v241_v42  ;;  %v216_v53 = vld [vmem:[#allocation7 + $0x20] sm:$0xff]  ;;  %v215_v55 = vld [vmem:[#allocation7 + $0x18] sm:$0xff]  ;;  %v234_v56 = vld [vmem:[#allocation8 + $0x30] sm:$0xff] }
  0x47   :  { %139 = vmatpush1.msra.mxu0 %v92_v18  ;;  %451 = vmatprep.subr.mxu1 %v644_v0  ;;  %v214_v57 = vld [vmem:[#allocation7 + $0x10] sm:$0xff]  ;;  %v233_v58 = vld [vmem:[#allocation8 + $0x28] sm:$0xff]  ;;  %v232_v60 = vld [vmem:[#allocation8 + $0x20] sm:$0xff] }
  0x48   :  { %140 = vmatprep.subr.mxu0 %v91_v19  ;;  %452 = vmatpush3.msra.mxu1 %v240_v44  ;;  %v213_v59 = vld [vmem:[#allocation7 + $0x8] sm:$0xff]  ;;  %v212_v61 = vld [vmem:[#allocation7] sm:$0xff]  ;;  %v231_v62 = vld [vmem:[#allocation8 + $0x18] sm:$0xff] }
  0x49   :  { %141 = vmatpush1.msra.mxu0 %v90_v20  ;;  %453 = vmatprep.subr.mxu1 %v644_v0  ;;  %v230_v63 = vld [vmem:[#allocation8 + $0x10] sm:$0xff]  ;;  %v229_v1 = vld [vmem:[#allocation8 + $0x8] sm:$0xff]  ;;  %v228_v2 = vld [vmem:[#allocation8] sm:$0xff] }
  0x4a   :  { %142 = vmatprep.subr.mxu0 %v89_v21  ;;  %454 = vmatpush3.msra.mxu1 %v239_v46  ;;  %v110_v6 = vld [vmem:[%s740_s2] sm:$0x3] }
  0x4b   :  { %143 = vmatpush1.msra.mxu0 %v88_v22  ;;  %455 = vmatprep.subr.mxu1 %v644_v0  ;;  %v115_v7 = vrot.slane %v110_v6, %v114_v5 }
  0x4c   :  { %144 = vmatprep.subr.mxu0 %v87_v23  ;;  %456 = vmatpush3.msra.mxu1 %v238_v48  ;;  %v119_v23 = vrot.slane %v110_v6, %v118_v16 }
  0x4d   :  { %145 = vmatpush1.msra.mxu0 %v86_v24  ;;  %457 = vmatprep.subr.mxu1 %v644_v0 }
  0x4e   :  { %146 = vmatprep.subr.mxu0 %v85_v25  ;;  %458 = vmatpush3.msra.mxu1 %v237_v50 }
  0x4f   :  { %147 = vmatpush1.msra.mxu0 %v84_v26  ;;  %459 = vmatprep.subr.mxu1 %v644_v0 }
  0x50   :  { %148 = vmatprep.subr.mxu0 %v83_v27  ;;  %460 = vmatpush3.msra.mxu1 %v236_v52 }
  0x51   :  { %149 = vmatpush1.msra.mxu0 %v82_v28  ;;  %461 = vmatprep.subr.mxu1 %v644_v0 }
  0x52   :  { %150 = vmatprep.subr.mxu0 %v81_v29  ;;  %462 = vmatpush3.msra.mxu1 %v235_v54 }
  0x53   :  { %151 = vmatpush1.msra.mxu0 %v80_v30  ;;  %463 = vmatprep.subr.mxu1 %v644_v0 }
  0x54   :  { %152 = vmatprep.subr.mxu0 %v79_v31  ;;  %464 = vmatpush3.msra.mxu1 %v234_v56 }
  0x55   :  { %153 = vmatpush1.msra.mxu0 %v78_v32  ;;  %465 = vmatprep.subr.mxu1 %v644_v0 }
  0x56   :  { %187 = vmatmul.mubr.f32.vlgmr.msra.gmra.mxu0 %v77_v33  ;;  %480 = vmatprep.subr.mxu0 %v644_v0 }
  0x57   :  { %481 = vmatpush3.msra.mxu0 %v227_v34  ;;  %466 = vmatpush3.msra.mxu1 %v233_v58 }
  0x58   :  { %482 = vmatprep.subr.mxu0 %v644_v0  ;;  %467 = vmatprep.subr.mxu1 %v644_v0 }
  0x59   :  { %483 = vmatpush3.msra.mxu0 %v226_v35  ;;  %468 = vmatpush3.msra.mxu1 %v232_v60  ;;  %v410_v35 = vld [vmem:[%s743_s5] ss:$0 sm:$0xff] }
  0x5a   :  { %484 = vmatprep.subr.mxu0 %v644_v0  ;;  %512 = vmatprep.mubr.msk.f32.mxu0 %vm645_vm0, %v644_v0 }
  0x5b   :  { %485 = vmatpush3.msra.mxu0 %v225_v36  ;;  %469 = vmatprep.subr.mxu1 %v644_v0 }
  0x5c   :  { %486 = vmatprep.subr.mxu0 %v644_v0  ;;  %470 = vmatpush3.msra.mxu1 %v231_v62 }
  0x5d   :  { %487 = vmatpush3.msra.mxu0 %v224_v37  ;;  %471 = vmatprep.subr.mxu1 %v644_v0 }
  0x5e   :  { %488 = vmatprep.subr.mxu0 %v644_v0  ;;  %472 = vmatpush3.msra.mxu1 %v230_v63 }
  0x5f   :  { %489 = vmatpush3.msra.mxu0 %v223_v39  ;;  %473 = vmatprep.subr.mxu1 %v644_v0 }
  0x60   :  { %490 = vmatprep.subr.mxu0 %v644_v0  ;;  %474 = vmatpush3.msra.mxu1 %v229_v1 }
  0x61   :  { %491 = vmatpush3.msra.mxu0 %v222_v41  ;;  %475 = vmatprep.subr.mxu1 %v644_v0 }
  0x62   :  { %492 = vmatprep.subr.mxu0 %v644_v0  ;;  %476 = vmatpush3.msra.mxu1 %v228_v2 }
  0x63   :  { %493 = vmatpush3.msra.mxu0 %v221_v43 }
  0x64   :  { %494 = vmatprep.subr.mxu0 %v644_v0 }
  0x65   :  { %495 = vmatpush3.msra.mxu0 %v220_v45 }
  0x66   :  { %496 = vmatprep.subr.mxu0 %v644_v0 }
  0x67   :  { %497 = vmatpush3.msra.mxu0 %v219_v47 }
  0x68   :  { %498 = vmatprep.subr.mxu0 %v644_v0 }
  0x69   :  { %499 = vmatpush3.msra.mxu0 %v218_v49 }
  0x6a   :  { %500 = vmatprep.subr.mxu0 %v644_v0 }
  0x6b   :  { %501 = vmatpush3.msra.mxu0 %v217_v51 }
  0x6c   :  { %502 = vmatprep.subr.mxu0 %v644_v0 }
  0x6d   :  { %503 = vmatpush3.msra.mxu0 %v216_v53 }
  0x6e   :  { %504 = vmatprep.subr.mxu0 %v644_v0 }
  0x6f   :  { %505 = vmatpush3.msra.mxu0 %v215_v55 }
  0x70   :  { %506 = vmatprep.subr.mxu0 %v644_v0 }
  0x71   :  { %507 = vmatpush3.msra.mxu0 %v214_v57 }
  0x72   :  { %508 = vmatprep.subr.mxu0 %v644_v0 }
  0x73   :  { %509 = vmatpush3.msra.mxu0 %v213_v59 }
  0x74   :  { %510 = vmatprep.subr.mxu0 %v644_v0 }
  0x75   :  { %511 = vmatpush3.msra.mxu0 %v212_v61 }
 0x116   :  { %v188_v8 = vpop.f32.mrf.mxu0 }
 0x117   :  { %v189_v9 = vadd.f32 %v188_v8, %v115_v7 }
 0x118   :  { %v190_v26 = vpop.f32.mrf.mxu0 }
 0x119   :  { %v193_v10 = vmul.f32 %v189_v9, %v189_v9  ;;  %v199_v17 = vmul.f32 0.5, %v189_v9  ;;  %v191_v29 = vadd.f32 %v190_v26, %v119_v23 }
 0x11b   :  { %v194_v11 = vmul.f32 0.044715, %v193_v10  ;;  %v202_v15 = vmul.f32 0.134145, %v193_v10 }
 0x11d   :  { %v195_v12 = vmul.f32 %v194_v11, %v189_v9  ;;  %v203_v19 = vadd.f32 1.0, %v202_v15 }
 0x11f   :  { %v196_v13 = vadd.f32 %v195_v12, %v189_v9  ;;  %v204_v24 = vmul.f32 0.7978846, %v203_v19 }
 0x121   :  { %v197_v14 = vmul.f32 0.7978846, %v196_v13 }
 0x123   :  { %526 = vtanh.f32 %v197_v14 }
 0x130   :  { %v527_v0 = vpop.eup %526 }
 0x131   :  { %v200_v18 = vadd.f32 1.0, %v527_v0  ;;  %v206_v20 = vmul.f32 %v527_v0, %v527_v0 }
 0x133   :  { %v207_v21 = vsub.f32 1.0, %v206_v20  ;;  %v201_v22 = vmul.f32 %v200_v18, %v199_v17  ;;  %v205_v27 = vmul.f32 0.5, %v200_v18 }
 0x135   :  { %v208_v25 = vmul.f32 %v207_v21, %v199_v17  ;;  %513 = vmatmul.mubr.f32.vlgmr.msra.gmra.mxu0 %v201_v22 }
 0x137   :  { %v209_v28 = vmul.f32 %v208_v25, %v204_v24 }
 0x139   :  { %v210_v30 = vadd.f32 %v209_v28, %v205_v27 }
 0x13b   :  { %v211_v31 = vmul.f32 %v210_v30, %v191_v29 }
 0x13d   :  { %478 = vmatmul.mubr.f32.vlgmr.msra.gmra.mxu1 %v211_v31 }
 0x1f5   :  { %v380_v32 = vpop.f32.mrf.mxu0 }
 0x1f7   :  { %v514_v33 = vpop.f32.mrf.mxu0 }
 0x1fd   :  { %v310_v34 = vpop.f32.mrf.mxu1 }
 0x1fe   :  { %v381_v36 = vadd.f32 %v380_v32, %v310_v34 }
 0x1ff   :  { %v479_v37 = vpop.f32.mrf.mxu1 }
 0x200   :  { %v391_v38 = vadd.f32 %v410_v35, %v381_v36 }
 0x202   :  { %392 = vst [vmem:[#allocation10] sm:$0xff] %v391_v38 }
 0x203   :  { %619 = shalt.err (!%p616_p10)
}
 0x204   :  { %402 = dma.vmem_to_hbm [thread:$0]  %s400_s21, 128, %s744_s6, [#allocation4]  }
 0x205   :  { %634 = dma.done.wait [#allocation4], 128  }
 0x206   :  { %635 = vsyncadd [#allocation4], 4294967168 }
 0x207   :  { %406 = vsyncpa [#allocation3], 1 }
 0x208   :  { %407 = vsyncpa [#allocation6], 1 }
 0x209   :  { %408 = vsyncpa [#allocation9], 1 }
 0x20a   :  { %409 = vsyncpa [#allocation4], 1 }

// kernel: tpu_custom_call.1
= control target key start
LH: loop header
LB: loop body
LE: loop exit
PB: predicated region body
PF: predicated region fallthrough
CT: control target
= control target key end

     0   :  { %11 = vsyncpa [#allocation3], 0  ;;  %s738_s0 = inlined_call_operand.hbm [shape: f32[8,128], index: 0, kind: input, shape index: {}]   ;;  %s739_s1 = inlined_call_operand.hbm [shape: f32[128,256], index: 1, kind: input, shape index: {}]   ;;  %s740_s2 = inlined_call_operand.vmem [shape: f32[1,256], index: 2, kind: input, shape index: {}]   ;;  %s741_s3 = inlined_call_operand.hbm [shape: f32[128,128], index: 3, kind: input, shape index: {}]   ;;  %s742_s4 = inlined_call_operand.hbm [shape: f32[128,128], index: 4, kind: input, shape index: {}]   ;;  %s743_s5 = inlined_call_operand.vmem [shape: f32[1,128], index: 5, kind: input, shape index: {}]   ;;  %s744_s6 = inlined_call_operand.hbm [shape: f32[8,128], index: 6, kind: output, shape index: {}]  }
   0x1   :  { %12 = vsyncpa [#allocation6], 0 }
   0x2   :  { %13 = vsyncpa [#allocation9], 0 }
   0x3   :  { %14 = vsyncpa [#allocation4], 0  ;;  %s636_s21 = smov [#allocation5]  }
   0x4   :  { %s30_s22 = sshll.u32 %s636_s21, 4  ;;  %s31_s22 = int_to_ptr.vmem [resolvable:$true] %s30_s22 }
   0x5   :  { %s536_s23 = scalar_lea.vmem %s31_s22, 4096  ;;  %p541_p1 = scmp.lt.s32.totalorder %s31_s22, %s31_s22 }
   0x6   :  { %p537_p0 = scmp.ne.s32.totalorder %s31_s22, %s536_s23  ;;  %p542_p2 = scmp.lt.s32.totalorder %s536_s23, %s536_s23 }
   0x8   :  { %p543_p3 = por %p542_p2, %p541_p1 }
   0xa   :  { %p544_p4 = pnand %p543_p3, %p537_p0 }
   0xc   :  { %547 = shalt.err (!%p544_p4)
}
   0xd   :  { %s637_s24 = smov 256   ;;  %s638_s25 = smov 16  }
   0xe   :  { %36 = dma.hbm_to_vmem [thread:$0]  %s739_s1, 4096, %s31_s22, [#allocation6], %s637_s24, %s637_s24, %s638_s25  }
   0xf   :  { %s639_s28 = smov [#allocation2]   ;;  %s640_s30 = smov [#allocation7]  }
  0x10   :  { %s21_s29 = sshll.u32 %s639_s28, 4  ;;  %s44_s7 = sshll.u32 %s640_s30, 4  ;;  %s22_s29 = int_to_ptr.vmem [resolvable:$true] %s21_s29  ;;  %s45_s7 = int_to_ptr.vmem [resolvable:$true] %s44_s7 }
  0x11   :  { %s556_s8 = scalar_lea.vmem %s22_s29, 128  ;;  %p561_p6 = scmp.lt.s32.totalorder %s22_s29, %s22_s29 }
  0x12   :  { %p557_p5 = scmp.ne.s32.totalorder %s22_s29, %s556_s8  ;;  %p562_p7 = scmp.lt.s32.totalorder %s556_s8, %s556_s8 }
  0x14   :  { %p563_p8 = por %p562_p7, %p561_p6 }
  0x16   :  { %p564_p9 = pnand %p563_p8, %p557_p5 }
  0x18   :  { %567 = shalt.err (!%p564_p9)
}
  0x19   :  { %24 = dma.hbm_to_vmem [thread:$0]  %s738_s0, 128, %s22_s29, [#allocation3]  }
  0x1a   :  { %s576_s11 = scalar_lea.vmem %s45_s7, 2048  ;;  %p581_p11 = scmp.lt.s32.totalorder %s45_s7, %s45_s7 }
  0x1b   :  { %p577_p10 = scmp.ne.s32.totalorder %s45_s7, %s576_s11  ;;  %p582_p12 = scmp.lt.s32.totalorder %s576_s11, %s576_s11 }
  0x1d   :  { %p583_p13 = por %p582_p12, %p581_p11 }
  0x1f   :  { %p584_p0 = pnand %p583_p13, %p577_p10 }
  0x21   :  { %587 = shalt.err (!%p584_p0)
}
  0x22   :  { %s641_s1 = smov 128   ;;  %s642_s12 = smov 8  }
  0x23   :  { %50 = dma.hbm_to_vmem [thread:$0]  %s741_s3, 2048, %s45_s7, [#allocation6], %s641_s1, %s641_s1, %s642_s12  }
  0x24   :  { %s643_s15 = smov [#allocation8]  }
  0x25   :  { %s56_s16 = sshll.u32 %s643_s15, 4  ;;  %s57_s16 = int_to_ptr.vmem [resolvable:$true] %s56_s16 }
  0x26   :  { %s596_s17 = scalar_lea.vmem %s57_s16, 2048  ;;  %p601_p2 = scmp.lt.s32.totalorder %s57_s16, %s57_s16 }
  0x27   :  { %p597_p1 = scmp.ne.s32.totalorder %s57_s16, %s596_s17  ;;  %p602_p3 = scmp.lt.s32.totalorder %s596_s17, %s596_s17 }
  0x29   :  { %p603_p4 = por %p602_p3, %p601_p2 }
  0x2b   :  { %p604_p5 = pnand %p603_p4, %p597_p1 }
  0x2d   :  { %607 = shalt.err (!%p604_p5)
}
  0x2e   :  { %62 = dma.hbm_to_vmem [thread:$0]  %s742_s4, 2048, %s57_s16, [#allocation9], %s641_s1, %s641_s1, %s642_s12  }
  0x2f   :  { %628 = dma.done.wait [#allocation3], 128  }
  0x30   :  { %629 = vsyncadd [#allocation3], 4294967168 }
  0x31   :  { %630 = dma.done.wait [#allocation6], 6144  }
  0x32   :  { %631 = vsyncadd [#allocation6], 4294961152 }
  0x33   :  { %632 = dma.done.wait [#allocation9], 2048  }
  0x34   :  { %633 = vsyncadd [#allocation9], 4294965248  ;;  %v644_v0 = vmov 0.0   ;;  %v109_v1 = vld [vmem:[#allocation5 + $0xf8] sm:$0xff]  ;;  %v108_v2 = vld [vmem:[#allocation5 + $0xf0] sm:$0xff]  ;;  %vm645_vm0 = vmmov 0  }
  0x35   :  { %186 = vmatprep.mubr.f32.mxu0 %v644_v0  ;;  %445 = vmatprep.subr.mxu1 %v644_v0  ;;  %v107_v3 = vld [vmem:[#allocation5 + $0xe8] sm:$0xff]  ;;  %v106_v4 = vld [vmem:[#allocation5 + $0xe0] sm:$0xff]  ;;  %v105_v5 = vld [vmem:[#allocation5 + $0xd8] sm:$0xff]  ;;  %s646_s20 = smov [#allocation10]  }
  0x36   :  { %122 = vmatprep.subr.mxu0 %v109_v1  ;;  %v104_v6 = vld [vmem:[#allocation5 + $0xd0] sm:$0xff]  ;;  %v103_v7 = vld [vmem:[#allocation5 + $0xc8] sm:$0xff]  ;;  %v102_v8 = vld [vmem:[#allocation5 + $0xc0] sm:$0xff]  ;;  %477 = vmatprep.mubr.msk.f32.mxu1 %vm645_vm0, %v644_v0  ;;  %s399_s21 = sshll.u32 %s646_s20, 4  ;;  %s400_s21 = int_to_ptr.vmem [resolvable:$true] %s399_s21 }
  0x37   :  { %123 = vmatpush1.msra.mxu0 %v108_v2  ;;  %v101_v9 = vld [vmem:[#allocation5 + $0xb8] sm:$0xff]  ;;  %v100_v10 = vld [vmem:[#allocation5 + $0xb0] sm:$0xff]  ;;  %v99_v11 = vld [vmem:[#allocation5 + $0xa8] sm:$0xff]  ;;  %s608_s22 = scalar_lea.vmem %s400_s21, 128  ;;  %p613_p7 = scmp.lt.s32.totalorder %s400_s21, %s400_s21 }
  0x38   :  { %124 = vmatprep.subr.mxu0 %v107_v3  ;;  %v98_v12 = vld [vmem:[#allocation5 + $0xa0] sm:$0xff]  ;;  %v97_v13 = vld [vmem:[#allocation5 + $0x98] sm:$0xff]  ;;  %v96_v14 = vld [vmem:[#allocation5 + $0x90] sm:$0xff]  ;;  %v112_v3 = vlaneseq  ;;  %p609_p6 = scmp.ne.s32.totalorder %s400_s21, %s608_s22  ;;  %p614_p8 = scmp.lt.s32.totalorder %s608_s22, %s608_s22 }
  0x39   :  { %125 = vmatpush1.msra.mxu0 %v106_v4  ;;  %v95_v15 = vld [vmem:[#allocation5 + $0x88] sm:$0xff]  ;;  %v94_v16 = vld [vmem:[#allocation5 + $0x80] sm:$0xff]  ;;  %v93_v17 = vld [vmem:[#allocation5 + $0x78] sm:$0xff] }
  0x3a   :  { %126 = vmatprep.subr.mxu0 %v105_v5  ;;  %v92_v18 = vld [vmem:[#allocation5 + $0x70] sm:$0xff]  ;;  %v91_v19 = vld [vmem:[#allocation5 + $0x68] sm:$0xff]  ;;  %v90_v20 = vld [vmem:[#allocation5 + $0x60] sm:$0xff]  ;;  %v113_v4 = vshrl.u32 %v112_v3, 7  ;;  %p615_p9 = por %p614_p8, %p613_p7 }
  0x3b   :  { %127 = vmatpush1.msra.mxu0 %v104_v6  ;;  %v89_v21 = vld [vmem:[#allocation5 + $0x58] sm:$0xff]  ;;  %v88_v22 = vld [vmem:[#allocation5 + $0x50] sm:$0xff]  ;;  %v87_v23 = vld [vmem:[#allocation5 + $0x48] sm:$0xff] }
  0x3c   :  { %128 = vmatprep.subr.mxu0 %v103_v7  ;;  %v86_v24 = vld [vmem:[#allocation5 + $0x40] sm:$0xff]  ;;  %v85_v25 = vld [vmem:[#allocation5 + $0x38] sm:$0xff]  ;;  %v84_v26 = vld [vmem:[#allocation5 + $0x30] sm:$0xff]  ;;  %v114_v5 = vsub.s32 0, %v113_v4  ;;  %p616_p10 = pnand %p615_p9, %p609_p6 }
  0x3d   :  { %129 = vmatpush1.msra.mxu0 %v102_v8  ;;  %v83_v27 = vld [vmem:[#allocation5 + $0x28] sm:$0xff]  ;;  %v82_v28 = vld [vmem:[#allocation5 + $0x20] sm:$0xff]  ;;  %v81_v29 = vld [vmem:[#allocation5 + $0x18] sm:$0xff] }
  0x3e   :  { %130 = vmatprep.subr.mxu0 %v101_v9  ;;  %v80_v30 = vld [vmem:[#allocation5 + $0x10] sm:$0xff]  ;;  %v79_v31 = vld [vmem:[#allocation5 + $0x8] sm:$0xff]  ;;  %v78_v32 = vld [vmem:[#allocation5] sm:$0xff] }
  0x3f   :  { %131 = vmatpush1.msra.mxu0 %v100_v10  ;;  %v77_v33 = vld [vmem:[#allocation2] sm:$0xff]  ;;  %v226_v35 = vld [vmem:[#allocation7 + $0x70] sm:$0xff]  ;;  %v225_v36 = vld [vmem:[#allocation7 + $0x68] sm:$0xff] }
  0x40   :  { %132 = vmatprep.subr.mxu0 %v99_v11  ;;  %v227_v34 = vld [vmem:[#allocation7 + $0x78] sm:$0xff]  ;;  %v224_v37 = vld [vmem:[#allocation7 + $0x60] sm:$0xff]  ;;  %v242_v40 = vld [vmem:[#allocation8 + $0x70] sm:$0xff] }
  0x41   :  { %133 = vmatpush1.msra.mxu0 %v98_v12  ;;  %v243_v38 = vld [vmem:[#allocation8 + $0x78] sm:$0xff]  ;;  %v222_v41 = vld [vmem:[#allocation7 + $0x50] sm:$0xff]  ;;  %v241_v42 = vld [vmem:[#allocation8 + $0x68] sm:$0xff] }
  0x42   :  { %134 = vmatprep.subr.mxu0 %v97_v13  ;;  %v223_v39 = vld [vmem:[#allocation7 + $0x58] sm:$0xff]  ;;  %446 = vmatpush3.msra.mxu1 %v243_v38  ;;  %v221_v43 = vld [vmem:[#allocation7 + $0x48] sm:$0xff]  ;;  %v240_v44 = vld [vmem:[#allocation8 + $0x60] sm:$0xff] }
  0x43   :  { %135 = vmatpush1.msra.mxu0 %v96_v14  ;;  %447 = vmatprep.subr.mxu1 %v644_v0  ;;  %v220_v45 = vld [vmem:[#allocation7 + $0x40] sm:$0xff]  ;;  %v239_v46 = vld [vmem:[#allocation8 + $0x58] sm:$0xff]  ;;  %v238_v48 = vld [vmem:[#allocation8 + $0x50] sm:$0xff] }
  0x44   :  { %136 = vmatprep.subr.mxu0 %v95_v15  ;;  %448 = vmatpush3.msra.mxu1 %v242_v40  ;;  %v219_v47 = vld [vmem:[#allocation7 + $0x38] sm:$0xff]  ;;  %v218_v49 = vld [vmem:[#allocation7 + $0x30] sm:$0xff]  ;;  %v237_v50 = vld [vmem:[#allocation8 + $0x48] sm:$0xff] }
  0x45   :  { %137 = vmatpush1.msra.mxu0 %v94_v16  ;;  %449 = vmatprep.subr.mxu1 %v644_v0  ;;  %v217_v51 = vld [vmem:[#allocation7 + $0x28] sm:$0xff]  ;;  %v236_v52 = vld [vmem:[#allocation8 + $0x40] sm:$0xff]  ;;  %v235_v54 = vld [vmem:[#allocation8 + $0x38] sm:$0xff]  ;;  %v118_v16 = vsub.s32 1, %v113_v4 }
  0x46   :  { %138 = vmatprep.subr.mxu0 %v93_v17  ;;  %450 = vmatpush3.msra.mxu1 %v241_v42  ;;  %v216_v53 = vld [vmem:[#allocation7 + $0x20] sm:$0xff]  ;;  %v215_v55 = vld [vmem:[#allocation7 + $0x18] sm:$0xff]  ;;  %v234_v56 = vld [vmem:[#allocation8 + $0x30] sm:$0xff] }
  0x47   :  { %139 = vmatpush1.msra.mxu0 %v92_v18  ;;  %451 = vmatprep.subr.mxu1 %v644_v0  ;;  %v214_v57 = vld [vmem:[#allocation7 + $0x10] sm:$0xff]  ;;  %v233_v58 = vld [vmem:[#allocation8 + $0x28] sm:$0xff]  ;;  %v232_v60 = vld [vmem:[#allocation8 + $0x20] sm:$0xff] }
  0x48   :  { %140 = vmatprep.subr.mxu0 %v91_v19  ;;  %452 = vmatpush3.msra.mxu1 %v240_v44  ;;  %v213_v59 = vld [vmem:[#allocation7 + $0x8] sm:$0xff]  ;;  %v212_v61 = vld [vmem:[#allocation7] sm:$0xff]  ;;  %v231_v62 = vld [vmem:[#allocation8 + $0x18] sm:$0xff] }
  0x49   :  { %141 = vmatpush1.msra.mxu0 %v90_v20  ;;  %453 = vmatprep.subr.mxu1 %v644_v0  ;;  %v230_v63 = vld [vmem:[#allocation8 + $0x10] sm:$0xff]  ;;  %v229_v1 = vld [vmem:[#allocation8 + $0x8] sm:$0xff]  ;;  %v228_v2 = vld [vmem:[#allocation8] sm:$0xff] }
  0x4a   :  { %142 = vmatprep.subr.mxu0 %v89_v21  ;;  %454 = vmatpush3.msra.mxu1 %v239_v46  ;;  %v110_v6 = vld [vmem:[%s740_s2] sm:$0x3] }
  0x4b   :  { %143 = vmatpush1.msra.mxu0 %v88_v22  ;;  %455 = vmatprep.subr.mxu1 %v644_v0  ;;  %v115_v7 = vrot.slane %v110_v6, %v114_v5 }
  0x4c   :  { %144 = vmatprep.subr.mxu0 %v87_v23  ;;  %456 = vmatpush3.msra.mxu1 %v238_v48  ;;  %v119_v23 = vrot.slane %v110_v6, %v118_v16 }
  0x4d   :  { %145 = vmatpush1.msra.mxu0 %v86_v24  ;;  %457 = vmatprep.subr.mxu1 %v644_v0 }
  0x4e   :  { %146 = vmatprep.subr.mxu0 %v85_v25  ;;  %458 = vmatpush3.msra.mxu1 %v237_v50 }
  0x4f   :  { %147 = vmatpush1.msra.mxu0 %v84_v26  ;;  %459 = vmatprep.subr.mxu1 %v644_v0 }
  0x50   :  { %148 = vmatprep.subr.mxu0 %v83_v27  ;;  %460 = vmatpush3.msra.mxu1 %v236_v52 }
  0x51   :  { %149 = vmatpush1.msra.mxu0 %v82_v28  ;;  %461 = vmatprep.subr.mxu1 %v644_v0 }
  0x52   :  { %150 = vmatprep.subr.mxu0 %v81_v29  ;;  %462 = vmatpush3.msra.mxu1 %v235_v54 }
  0x53   :  { %151 = vmatpush1.msra.mxu0 %v80_v30  ;;  %463 = vmatprep.subr.mxu1 %v644_v0 }
  0x54   :  { %152 = vmatprep.subr.mxu0 %v79_v31  ;;  %464 = vmatpush3.msra.mxu1 %v234_v56 }
  0x55   :  { %153 = vmatpush1.msra.mxu0 %v78_v32  ;;  %465 = vmatprep.subr.mxu1 %v644_v0 }
  0x56   :  { %187 = vmatmul.mubr.f32.vlgmr.msra.gmra.mxu0 %v77_v33  ;;  %480 = vmatprep.subr.mxu0 %v644_v0 }
  0x57   :  { %481 = vmatpush3.msra.mxu0 %v227_v34  ;;  %466 = vmatpush3.msra.mxu1 %v233_v58 }
  0x58   :  { %482 = vmatprep.subr.mxu0 %v644_v0  ;;  %467 = vmatprep.subr.mxu1 %v644_v0 }
  0x59   :  { %483 = vmatpush3.msra.mxu0 %v226_v35  ;;  %468 = vmatpush3.msra.mxu1 %v232_v60  ;;  %v410_v35 = vld [vmem:[%s743_s5] ss:$0 sm:$0xff] }
  0x5a   :  { %484 = vmatprep.subr.mxu0 %v644_v0  ;;  %512 = vmatprep.mubr.msk.f32.mxu0 %vm645_vm0, %v644_v0 }
  0x5b   :  { %485 = vmatpush3.msra.mxu0 %v225_v36  ;;  %469 = vmatprep.subr.mxu1 %v644_v0 }
  0x5c   :  { %486 = vmatprep.subr.mxu0 %v644_v0  ;;  %470 = vmatpush3.msra.mxu1 %v231_v62 }
  0x5d   :  { %487 = vmatpush3.msra.mxu0 %v224_v37  ;;  %471 = vmatprep.subr.mxu1 %v644_v0 }
  0x5e   :  { %488 = vmatprep.subr.mxu0 %v644_v0  ;;  %472 = vmatpush3.msra.mxu1 %v230_v63 }
  0x5f   :  { %489 = vmatpush3.msra.mxu0 %v223_v39  ;;  %473 = vmatprep.subr.mxu1 %v644_v0 }
  0x60   :  { %490 = vmatprep.subr.mxu0 %v644_v0  ;;  %474 = vmatpush3.msra.mxu1 %v229_v1 }
  0x61   :  { %491 = vmatpush3.msra.mxu0 %v222_v41  ;;  %475 = vmatprep.subr.mxu1 %v644_v0 }
  0x62   :  { %492 = vmatprep.subr.mxu0 %v644_v0  ;;  %476 = vmatpush3.msra.mxu1 %v228_v2 }
  0x63   :  { %493 = vmatpush3.msra.mxu0 %v221_v43 }
  0x64   :  { %494 = vmatprep.subr.mxu0 %v644_v0 }
  0x65   :  { %495 = vmatpush3.msra.mxu0 %v220_v45 }
  0x66   :  { %496 = vmatprep.subr.mxu0 %v644_v0 }
  0x67   :  { %497 = vmatpush3.msra.mxu0 %v219_v47 }
  0x68   :  { %498 = vmatprep.subr.mxu0 %v644_v0 }
  0x69   :  { %499 = vmatpush3.msra.mxu0 %v218_v49 }
  0x6a   :  { %500 = vmatprep.subr.mxu0 %v644_v0 }
  0x6b   :  { %501 = vmatpush3.msra.mxu0 %v217_v51 }
  0x6c   :  { %502 = vmatprep.subr.mxu0 %v644_v0 }
  0x6d   :  { %503 = vmatpush3.msra.mxu0 %v216_v53 }
  0x6e   :  { %504 = vmatprep.subr.mxu0 %v644_v0 }
  0x6f   :  { %505 = vmatpush3.msra.mxu0 %v215_v55 }
  0x70   :  { %506 = vmatprep.subr.mxu0 %v644_v0 }
  0x71   :  { %507 = vmatpush3.msra.mxu0 %v214_v57 }
  0x72   :  { %508 = vmatprep.subr.mxu0 %v644_v0 }
  0x73   :  { %509 = vmatpush3.msra.mxu0 %v213_v59 }
  0x74   :  { %510 = vmatprep.subr.mxu0 %v644_v0 }
  0x75   :  { %511 = vmatpush3.msra.mxu0 %v212_v61 }
 0x116   :  { %v188_v8 = vpop.f32.mrf.mxu0 }
 0x117   :  { %v189_v9 = vadd.f32 %v188_v8, %v115_v7 }
 0x118   :  { %v190_v26 = vpop.f32.mrf.mxu0 }
 0x119   :  { %v193_v10 = vmul.f32 %v189_v9, %v189_v9  ;;  %v199_v17 = vmul.f32 0.5, %v189_v9  ;;  %v191_v29 = vadd.f32 %v190_v26, %v119_v23 }
 0x11b   :  { %v194_v11 = vmul.f32 0.044715, %v193_v10  ;;  %v202_v15 = vmul.f32 0.134145, %v193_v10 }
 0x11d   :  { %v195_v12 = vmul.f32 %v194_v11, %v189_v9  ;;  %v203_v19 = vadd.f32 1.0, %v202_v15 }
 0x11f   :  { %v196_v13 = vadd.f32 %v195_v12, %v189_v9  ;;  %v204_v24 = vmul.f32 0.7978846, %v203_v19 }
 0x121   :  { %v197_v14 = vmul.f32 0.7978846, %v196_v13 }
 0x123   :  { %526 = vtanh.f32 %v197_v14 }
 0x130   :  { %v527_v0 = vpop.eup %526 }
 0x131   :  { %v200_v18 = vadd.f32 1.0, %v527_v0  ;;  %v206_v20 = vmul.f32 %v527_v0, %v527_v0 }
 0x133   :  { %v207_v21 = vsub.f32 1.0, %v206_v20  ;;  %v201_v22 = vmul.f32 %v200_v18, %v199_v17  ;;  %v205_v27 = vmul.f32 0.5, %v200_v18 }
 0x135   :  { %v208_v25 = vmul.f32 %v207_v21, %v199_v17  ;;  %513 = vmatmul.mubr.f32.vlgmr.msra.gmra.mxu0 %v201_v22 }
 0x137   :  { %v209_v28 = vmul.f32 %v208_v25, %v204_v24 }
 0x139   :  { %v210_v30 = vadd.f32 %v209_v28, %v205_v27 }
 0x13b   :  { %v211_v31 = vmul.f32 %v210_v30, %v191_v29 }
 0x13d   :  { %478 = vmatmul.mubr.f32.vlgmr.msra.gmra.mxu1 %v211_v31 }
 0x1f5   :  { %v380_v32 = vpop.f32.mrf.mxu0 }
 0x1f7   :  { %v514_v33 = vpop.f32.mrf.mxu0 }
 0x1fd   :  { %v310_v34 = vpop.f32.mrf.mxu1 }
 0x1fe   :  { %v381_v36 = vadd.f32 %v380_v32, %v310_v34 }
 0x1ff   :  { %v479_v37 = vpop.f32.mrf.mxu1 }
 0x200   :  { %v391_v38 = vadd.f32 %v410_v35, %v381_v36 }
 0x202   :  { %392 = vst [vmem:[#allocation10] sm:$0xff] %v391_v38 }
 0x203   :  { %619 = shalt.err (!%p616_p10)
}
 0x204   :  { %402 = dma.vmem_to_hbm [thread:$0]  %s400_s21, 128, %s744_s6, [#allocation4]  }
 0x205   :  { %634 = dma.done.wait [#allocation4], 128  }
 0x206   :  { %635 = vsyncadd [#allocation4], 4294967168 }
 0x207   :  { %406 = vsyncpa [#allocation3], 1 }
 0x208   :  { %407 = vsyncpa [#allocation6], 1 }
 0x209   :  { %408 = vsyncpa [#allocation9], 1 }
 0x20a   :  { %409 = vsyncpa [#allocation4], 1 }

</bundles_post_ra>
